<compile_context>
chip_gen: v6e
topology: v6e:2x2x1
jax: 0.10.0
libtpu: 0.0.40
codegen_flags: <defaults>
</compile_context>

<pallas_src>
import functools

import jax
import jax.numpy as jnp
from jax.experimental import pallas as pl
from jax.experimental.pallas import tpu as pltpu


def hdgcn_kernel(g_ref, x_ref,
                 w1_ref, b1_ref, w2_ref, b2_ref,
                 wih_ref, whh_ref, blstm_ref,
                 wproj1_ref, wproj2_ref, bproj_ref,
                 assign_t_ref, wlin_t_ref, blin_ref,
                 out_ref):
    B = g_ref.shape[0]              # 2*T graph snapshots, interleaved by timestep
    N = g_ref.shape[1]              # nodes per graph (== cluster)
    T = B // 2
    H = whh_ref.shape[0]            # lstm_hid
    G4 = whh_ref.shape[1]           # 4 * lstm_hid
    f32 = jnp.float32
    cdt = w1_ref.dtype              # MXU compute dtype (f32 or bf16)

    def _c(v):                      # cast to MXU dtype only when needed
        return v if v.dtype == cdt else v.astype(cdt)

    g_all = g_ref[...]              # (B, N, N)
    x_all = x_ref[...]              # (B*N, F)

    # ---------------- GCN layer 1 ----------------
    # One feature matmul for ALL 2T snapshots + ONE batched aggregation matmul
    # (replaces 2T tiny per-timestep MXU launches).
    xw = jnp.dot(x_all, w1_ref[...], preferred_element_type=f32)          # (B*N, gh)
    ax = jnp.einsum('bij,bjh->bih', g_all, _c(xw).reshape(B, N, -1),
                    preferred_element_type=f32)                           # (B, N, gh)
    h_act = jnp.maximum(ax + b1_ref[...], 0.0)

    # ---------------- GCN layer 2 ----------------
    hw = jnp.dot(_c(h_act.reshape(B * N, -1)), w2_ref[...],
                 preferred_element_type=f32)                              # (B*N, go)
    ah = jnp.einsum('bij,bjh->bih', g_all, _c(hw).reshape(B, N, -1),
                    preferred_element_type=f32)                           # (B, N, go)
    y_all = (ah + b2_ref[...]).reshape(B * N, -1)                         # (B*N, go)

    # -------- LSTM: both sequences fused into one (2N, H) recurrence --------
    # Hoisted input projection: one matmul for all 2*T steps.
    gates_x = (jnp.dot(_c(y_all), wih_ref[...], preferred_element_type=f32)
               + blstm_ref[...])                                          # (B*N, 4H)

    whh = whh_ref[...]                                                    # hoisted load
    lane = jax.lax.broadcasted_iota(jnp.int32, (2 * N, G4), 1)
    is_g = (lane >= 2 * H) & (lane < 3 * H)                               # tanh lanes
    # tanh(x) = 2*sigmoid(2x) - 1  -> ONE full-width sigmoid per step on the
    # serial path instead of sigmoid + tanh (halves EUP pushes per step).
    g_scale = jnp.where(is_g, 2.0, 1.0).astype(f32)

    h = jnp.zeros((2 * N, H), f32)
    c = jnp.zeros((2 * N, H), f32)
    # Short fixed trip count -> static loop is fine.
    # TODO(synk): switch to lax.fori_loop(..., unroll=True) if T grows large.
    for t in range(T):
        pre = (gates_x[t * 2 * N:(t + 1) * 2 * N, :]
               + jnp.dot(_c(h), whh, preferred_element_type=f32))         # (2N, 4H)
        s = jax.nn.sigmoid(pre * g_scale)
        act = jnp.where(is_g, 2.0 * s - 1.0, s)                           # gate order [i,f,g,o]
        i_g = act[:, 0 * H:1 * H]
        f_g = act[:, 1 * H:2 * H]
        g_g = act[:, 2 * H:3 * H]
        o_g = act[:, 3 * H:4 * H]
        c = f_g * c + i_g * g_g
        h = o_g * jnp.tanh(c)

    # Output projection: hcat @ Wproj == h1 @ Wproj[:H] + h2 @ Wproj[H:]
    # (avoids a lane-axis concat; h1/h2 are sublane slices of the fused state).
    out = (jnp.dot(_c(h[:N, :]), wproj1_ref[...], preferred_element_type=f32)
           + jnp.dot(_c(h[N:, :]), wproj2_ref[...], preferred_element_type=f32)
           + bproj_ref[...])                                              # (N, lstm_out)

    # out = Assign_Matrix.T * out   (elementwise; cluster==N, gcn_in==lstm_out)
    out = assign_t_ref[...] * out
    # TODO(synk): dropout implemented as inference-mode identity (no RNG mask).
    # Final Linear(output_dim, lstm_out): x @ W.T + b  (W.T precomputed once).
    out = jnp.dot(_c(out), wlin_t_ref[...], preferred_element_type=f32) + blin_ref[...]
    out_ref[...] = out.astype(out_ref.dtype)


def prepare_params(params, compute_dtype=jnp.float32):
    """One-time parameter preprocessing (do NOT redo per forward call).

    MXU-side weight matrices are cast to `compute_dtype` (bf16 halves DMA
    bytes / VMEM); biases and elementwise params stay f32 (VPU/EUP path).
    """
    H = params["whh"].shape[0]
    cdt = compute_dtype
    p = {
        # MXU operands
        "w1":     jnp.asarray(params["w1"], cdt),
        "w2":     jnp.asarray(params["w2"], cdt),
        "wih":    jnp.asarray(params["wih"], cdt),
        "whh":    jnp.asarray(params["whh"], cdt),
        "wproj1": jnp.asarray(params["wproj"][:H, :], cdt),   # pre-split Wproj
        "wproj2": jnp.asarray(params["wproj"][H:, :], cdt),
        "wlin_t": jnp.asarray(params["wlin"].T, cdt),          # PyTorch Linear -> x @ W.T
        # f32 elementwise params
        "b1":     jnp.asarray(params["b1"], jnp.float32),
        "b2":     jnp.asarray(params["b2"], jnp.float32),
        "blstm":  jnp.asarray(params["blstm"], jnp.float32),
        "bproj":  jnp.asarray(params["bproj"], jnp.float32),
        "assign_t": jnp.asarray(params["assign"].T, jnp.float32),  # (cluster, gcn_in)
        "blin":   jnp.asarray(params["blin"], jnp.float32),
    }
    return p


@jax.jit
def hdgcn_forward(g1, f1, g2, f2, p):
    """p must come from prepare_params()."""
    T, N = g1.shape[0], g1.shape[1]
    F = f1.shape[-1]
    cdt = p["w1"].dtype
    lstm_out = p["blin"].shape[-1]

    # Shape-contract checks implied by `Assign_Matrix.T * out` and Linear.
    assert p["assign_t"].shape == (N, lstm_out), "requires cluster == N and gcn_in == lstm_out"
    assert p["wlin_t"].shape[0] == lstm_out, "requires output_dim == lstm_out"

    # Layout plumbing done in the wrapper (free XLA work, no in-kernel concat):
    # interleave by timestep so block b = t*2 + s and the fused LSTM slices a
    # contiguous (2N, .) block per step.
    g_all = jnp.stack([g1, g2], axis=1).reshape(2 * T, N, N).astype(cdt)
    x_all = jnp.stack([f1, f2], axis=1).reshape(2 * T * N, F).astype(cdt)

    args = (g_all, x_all,
            p["w1"], p["b1"], p["w2"], p["b2"],
            p["wih"], p["whh"], p["blstm"],
            p["wproj1"], p["wproj2"], p["bproj"],
            p["assign_t"], p["wlin_t"], p["blin"])

    # Generous-but-bounded scoped-VMEM request (default scoped limits are far
    # below physical; cap at 64 MiB so it is valid on v7x as well).
    total_in_bytes = sum(int(a.size) * a.dtype.itemsize for a in args)
    vmem_limit = int(min(max(4 * total_in_bytes + (8 << 20), 32 << 20), 64 << 20))

    return pl.pallas_call(
        hdgcn_kernel,
        out_shape=jax.ShapeDtypeStruct((N, lstm_out), jnp.float32),
        in_specs=[pl.BlockSpec(memory_space=pltpu.MemorySpace.VMEM)] * len(args),
        out_specs=pl.BlockSpec(memory_space=pltpu.MemorySpace.VMEM),
        compiler_params=pltpu.CompilerParams(vmem_limit_bytes=vmem_limit),
    )(*args)


def reference_forward(g1, f1, g2, f2, params):
    """Pure-JAX mirror of the original (un-fused) computation."""
    H = params["whh"].shape[0]

    def gcn(adj, x):
        h = jnp.maximum(adj @ x @ params["w1"] + params["b1"], 0.0)
        return adj @ h @ params["w2"] + params["b2"]

    def lstm_last_hidden(xs):
        n = xs[0].shape[0]
        h = jnp.zeros((n, H), jnp.float32)
        c = jnp.zeros((n, H), jnp.float32)
        for x in xs:
            gates = x @ params["wih"] + h @ params["whh"] + params["blstm"]
            i = jax.nn.sigmoid(gates[:, 0 * H:1 * H])
            f = jax.nn.sigmoid(gates[:, 1 * H:2 * H])
            g = jnp.tanh(gates[:, 2 * H:3 * H])
            o = jax.nn.sigmoid(gates[:, 3 * H:4 * H])
            c = f * c + i * g
            h = o * jnp.tanh(c)
        return h

    T = g1.shape[0]
    xs1 = [gcn(g1[t], f1[t]) for t in range(T)]
    xs2 = [gcn(g2[t], f2[t]) for t in range(T)]
    hcat = jnp.concatenate([lstm_last_hidden(xs1), lstm_last_hidden(xs2)], axis=-1)
    out = hcat @ params["wproj"] + params["bproj"]
    out = params["assign"].T * out
    out = out @ params["wlin"].T + params["blin"]
    return out


if __name__ == "__main__":
    # Small shapes consistent with the module's shape constraints.
    N = 8            # nodes per graph == cluster
    T = 4            # time_split
    gcn_in = 16      # == output_dim == lstm_out (required by forward())
    gcn_hid = 32
    gcn_out = 16
    lstm_hid = 16
    lstm_out = 16
    cluster = N
    output_dim = gcn_in

    key = jax.random.PRNGKey(0)
    ks = jax.random.split(key, 16)

    g1 = jax.random.uniform(ks[0], (T, N, N), jnp.float32)
    f1 = jax.random.normal(ks[1], (T, N, gcn_in), jnp.float32)
    g2 = jax.random.uniform(ks[2], (T, N, N), jnp.float32)
    f2 = jax.random.normal(ks[3], (T, N, gcn_in), jnp.float32)

    def init(k, shape, scale=0.1):
        return scale * jax.random.normal(k, shape, jnp.float32)

    params = {
        "w1":    init(ks[4],  (gcn_in, gcn_hid)),
        "b1":    init(ks[5],  (1, gcn_hid)),
        "w2":    init(ks[6],  (gcn_hid, gcn_out)),
        "b2":    init(ks[7],  (1, gcn_out)),
        "wih":   init(ks[8],  (gcn_out, 4 * lstm_hid)),
        "whh":   init(ks[9],  (lstm_hid, 4 * lstm_hid)),
        "blstm": init(ks[10], (1, 4 * lstm_hid)),      # = b_ih + b_hh, pre-summed
        "wproj": init(ks[11], (2 * lstm_hid, lstm_out)),
        "bproj": init(ks[12], (1, lstm_out)),
        "assign": init(ks[13], (gcn_in, cluster)),     # nn.Parameter(gcn_in, cluster)
        "wlin":  init(ks[14], (lstm_out, output_dim)), # PyTorch Linear weight layout
        "blin":  init(ks[15], (1, lstm_out)),
    }

    ref = reference_forward(g1, f1, g2, f2, params)

    # f32 MXU path: exact parity with the reference.
    prepared = prepare_params(params)                           # one-time preprocessing
    out = jax.block_until_ready(hdgcn_forward(g1, f1, g2, f2, prepared))
    assert out.shape == (N, lstm_out)
    assert jnp.allclose(out, ref, atol=1e-4, rtol=1e-4)

    # bf16 MXU path: halves DMA bytes / VMEM (f32 accumulation, f32 gate math).
    prepared_bf16 = prepare_params(params, compute_dtype=jnp.bfloat16)
    out_bf16 = jax.block_until_ready(hdgcn_forward(g1, f1, g2, f2, prepared_bf16))
    assert out_bf16.shape == (N, lstm_out)
    assert jnp.allclose(out_bf16, ref, atol=5e-2, rtol=5e-2)

    print("KERNEL_OK")
</pallas_src>

<mosaic_0001>
module attributes {stable_mosaic.version = 11 : i64} {
  func.func @hdgcn_kernel(%arg0: memref<8x8x8xf32, #tpu.memory_space<vmem>>, %arg1: memref<64x16xf32, #tpu.memory_space<vmem>>, %arg2: memref<16x32xf32, #tpu.memory_space<vmem>>, %arg3: memref<1x32xf32, #tpu.memory_space<vmem>>, %arg4: memref<32x16xf32, #tpu.memory_space<vmem>>, %arg5: memref<1x16xf32, #tpu.memory_space<vmem>>, %arg6: memref<16x64xf32, #tpu.memory_space<vmem>>, %arg7: memref<16x64xf32, #tpu.memory_space<vmem>>, %arg8: memref<1x64xf32, #tpu.memory_space<vmem>>, %arg9: memref<16x16xf32, #tpu.memory_space<vmem>>, %arg10: memref<16x16xf32, #tpu.memory_space<vmem>>, %arg11: memref<1x16xf32, #tpu.memory_space<vmem>>, %arg12: memref<8x16xf32, #tpu.memory_space<vmem>>, %arg13: memref<16x16xf32, #tpu.memory_space<vmem>>, %arg14: memref<1x16xf32, #tpu.memory_space<vmem>>, %arg15: memref<8x16xf32, #tpu.memory_space<vmem>>) attributes {dimension_semantics = [], scalar_prefetch = 0 : i64, scratch_operands = 0 : i64, tpu.core_type = #tpu.core_type<tc>} {
    %c0 = arith.constant 0 : index
    %c0_0 = arith.constant 0 : index
    %c0_1 = arith.constant 0 : index
    %0 = vector.load %arg0[%c0, %c0_0, %c0_1] : memref<8x8x8xf32, #tpu.memory_space<vmem>>, vector<8x8x8xf32>
    %c0_2 = arith.constant 0 : index
    %c0_3 = arith.constant 0 : index
    %1 = vector.load %arg1[%c0_2, %c0_3] : memref<64x16xf32, #tpu.memory_space<vmem>>, vector<64x16xf32>
    %c0_4 = arith.constant 0 : index
    %c0_5 = arith.constant 0 : index
    %2 = vector.load %arg2[%c0_4, %c0_5] : memref<16x32xf32, #tpu.memory_space<vmem>>, vector<16x32xf32>
    %cst = arith.constant dense<0.000000e+00> : vector<64x32xf32>
    %3 = tpu.matmul %1, %2, %cst {dimension_numbers = #tpu.dot_dimension_numbers<[1], [0], [0], [1], [0, 0, 1, 1], [], []>} : vector<64x16xf32>, vector<16x32xf32>, vector<64x32xf32> -> vector<64x32xf32>
    %4 = vector.shape_cast %3 : vector<64x32xf32> to vector<8x8x32xf32>
    "tpu.trace_start"() <{level = 10 : i32, message = "bij,bjh->bih"}> : () -> ()
    %cst_6 = arith.constant dense<0.000000e+00> : vector<8x8x32xf32>
    %5 = tpu.matmul %0, %4, %cst_6 {dimension_numbers = #tpu.dot_dimension_numbers<[2], [1], [1], [2], [0, 0, 0, 1, 1, 2], [0], [0]>} : vector<8x8x8xf32>, vector<8x8x32xf32>, vector<8x8x32xf32> -> vector<8x8x32xf32>
    "tpu.trace_stop"() : () -> ()
    %c0_7 = arith.constant 0 : index
    %c0_8 = arith.constant 0 : index
    %6 = vector.load %arg3[%c0_7, %c0_8] : memref<1x32xf32, #tpu.memory_space<vmem>>, vector<1x32xf32>
    %7 = vector.shape_cast %6 : vector<1x32xf32> to vector<1x1x32xf32>
    %8 = vector.broadcast %7 : vector<1x1x32xf32> to vector<8x8x32xf32>
    %9 = arith.addf %5, %8 : vector<8x8x32xf32>
    %cst_9 = arith.constant 0.000000e+00 : f32
    %10 = vector.broadcast %cst_9 : f32 to vector<8x8x32xf32>
    %11 = arith.maximumf %9, %10 : vector<8x8x32xf32>
    %12 = vector.shape_cast %11 : vector<8x8x32xf32> to vector<64x32xf32>
    %c0_10 = arith.constant 0 : index
    %c0_11 = arith.constant 0 : index
    %13 = vector.load %arg4[%c0_10, %c0_11] : memref<32x16xf32, #tpu.memory_space<vmem>>, vector<32x16xf32>
    %cst_12 = arith.constant dense<0.000000e+00> : vector<64x16xf32>
    %14 = tpu.matmul %12, %13, %cst_12 {dimension_numbers = #tpu.dot_dimension_numbers<[1], [0], [0], [1], [0, 0, 1, 1], [], []>} : vector<64x32xf32>, vector<32x16xf32>, vector<64x16xf32> -> vector<64x16xf32>
    %15 = vector.shape_cast %14 : vector<64x16xf32> to vector<8x8x16xf32>
    "tpu.trace_start"() <{level = 10 : i32, message = "bij,bjh->bih"}> : () -> ()
    %cst_13 = arith.constant dense<0.000000e+00> : vector<8x8x16xf32>
    %16 = tpu.matmul %0, %15, %cst_13 {dimension_numbers = #tpu.dot_dimension_numbers<[2], [1], [1], [2], [0, 0, 0, 1, 1, 2], [0], [0]>} : vector<8x8x8xf32>, vector<8x8x16xf32>, vector<8x8x16xf32> -> vector<8x8x16xf32>
    "tpu.trace_stop"() : () -> ()
    %c0_14 = arith.constant 0 : index
    %c0_15 = arith.constant 0 : index
    %17 = vector.load %arg5[%c0_14, %c0_15] : memref<1x16xf32, #tpu.memory_space<vmem>>, vector<1x16xf32>
    %18 = vector.shape_cast %17 : vector<1x16xf32> to vector<1x1x16xf32>
    %19 = vector.broadcast %18 : vector<1x1x16xf32> to vector<8x8x16xf32>
    %20 = arith.addf %16, %19 : vector<8x8x16xf32>
    %21 = vector.shape_cast %20 : vector<8x8x16xf32> to vector<64x16xf32>
    %c0_16 = arith.constant 0 : index
    %c0_17 = arith.constant 0 : index
    %22 = vector.load %arg6[%c0_16, %c0_17] : memref<16x64xf32, #tpu.memory_space<vmem>>, vector<16x64xf32>
    %cst_18 = arith.constant dense<0.000000e+00> : vector<64x64xf32>
    %23 = tpu.matmul %21, %22, %cst_18 {dimension_numbers = #tpu.dot_dimension_numbers<[1], [0], [0], [1], [0, 0, 1, 1], [], []>} : vector<64x16xf32>, vector<16x64xf32>, vector<64x64xf32> -> vector<64x64xf32>
    %c0_19 = arith.constant 0 : index
    %c0_20 = arith.constant 0 : index
    %24 = vector.load %arg8[%c0_19, %c0_20] : memref<1x64xf32, #tpu.memory_space<vmem>>, vector<1x64xf32>
    %25 = vector.broadcast %24 : vector<1x64xf32> to vector<64x64xf32>
    %26 = arith.addf %23, %25 : vector<64x64xf32>
    %c0_21 = arith.constant 0 : index
    %c0_22 = arith.constant 0 : index
    %27 = vector.load %arg7[%c0_21, %c0_22] : memref<16x64xf32, #tpu.memory_space<vmem>>, vector<16x64xf32>
    %28 = tpu.iota {dimensions = array<i32: 1>} : vector<16x64xi32>
    %c32_i32 = arith.constant 32 : i32
    %29 = vector.broadcast %c32_i32 : i32 to vector<16x64xi32>
    %30 = arith.cmpi sge, %28, %29 : vector<16x64xi32>
    %c48_i32 = arith.constant 48 : i32
    %31 = vector.broadcast %c48_i32 : i32 to vector<16x64xi32>
    %32 = arith.cmpi slt, %28, %31 : vector<16x64xi32>
    %33 = arith.andi %30, %32 : vector<16x64xi1>
    %cst_23 = arith.constant 2.000000e+00 : f32
    %cst_24 = arith.constant 1.000000e+00 : f32
    %34 = vector.broadcast %cst_23 : f32 to vector<16x64xf32>
    %35 = vector.broadcast %cst_24 : f32 to vector<16x64xf32>
    %36 = arith.select %33, %34, %35 : vector<16x64xi1>, vector<16x64xf32>
    %cst_25 = arith.constant 0.000000e+00 : f32
    %37 = vector.broadcast %cst_25 : f32 to vector<16x16xf32>
    %cst_26 = arith.constant 0.000000e+00 : f32
    %38 = vector.broadcast %cst_26 : f32 to vector<16x16xf32>
    %39 = vector.extract_strided_slice %26 {offsets = [0, 0], sizes = [16, 64], strides = [1, 1]} : vector<64x64xf32> to vector<16x64xf32>
    %cst_27 = arith.constant dense<0.000000e+00> : vector<16x64xf32>
    %40 = tpu.matmul %37, %27, %cst_27 {dimension_numbers = #tpu.dot_dimension_numbers<[1], [0], [0], [1], [0, 0, 1, 1], [], []>} : vector<16x16xf32>, vector<16x64xf32>, vector<16x64xf32> -> vector<16x64xf32>
    %41 = arith.addf %39, %40 : vector<16x64xf32>
    %42 = arith.mulf %41, %36 : vector<16x64xf32>
    %43 = arith.negf %42 : vector<16x64xf32>
    %44 = math.exp %43 : vector<16x64xf32>
    %cst_28 = arith.constant 1.000000e+00 : f32
    %45 = vector.broadcast %cst_28 : f32 to vector<16x64xf32>
    %46 = arith.addf %45, %44 : vector<16x64xf32>
    %47 = arith.divf %45, %46 : vector<16x64xf32>
    %cst_29 = arith.constant 2.000000e+00 : f32
    %48 = vector.broadcast %cst_29 : f32 to vector<16x64xf32>
    %49 = arith.mulf %48, %47 : vector<16x64xf32>
    %cst_30 = arith.constant 1.000000e+00 : f32
    %50 = vector.broadcast %cst_30 : f32 to vector<16x64xf32>
    %51 = arith.subf %49, %50 : vector<16x64xf32>
    %52 = arith.select %33, %51, %47 : vector<16x64xi1>, vector<16x64xf32>
    %53 = vector.extract_strided_slice %52 {offsets = [0, 0], sizes = [16, 16], strides = [1, 1]} : vector<16x64xf32> to vector<16x16xf32>
    %54 = vector.extract_strided_slice %52 {offsets = [0, 16], sizes = [16, 16], strides = [1, 1]} : vector<16x64xf32> to vector<16x16xf32>
    %55 = vector.extract_strided_slice %52 {offsets = [0, 32], sizes = [16, 16], strides = [1, 1]} : vector<16x64xf32> to vector<16x16xf32>
    %56 = vector.extract_strided_slice %52 {offsets = [0, 48], sizes = [16, 16], strides = [1, 1]} : vector<16x64xf32> to vector<16x16xf32>
    %57 = arith.mulf %54, %38 : vector<16x16xf32>
    %58 = arith.mulf %53, %55 : vector<16x16xf32>
    %59 = arith.addf %57, %58 : vector<16x16xf32>
    %60 = math.tanh %59 : vector<16x16xf32>
    %61 = arith.mulf %56, %60 : vector<16x16xf32>
    %62 = vector.extract_strided_slice %26 {offsets = [16, 0], sizes = [16, 64], strides = [1, 1]} : vector<64x64xf32> to vector<16x64xf32>
    %cst_31 = arith.constant dense<0.000000e+00> : vector<16x64xf32>
    %63 = tpu.matmul %61, %27, %cst_31 {dimension_numbers = #tpu.dot_dimension_numbers<[1], [0], [0], [1], [0, 0, 1, 1], [], []>} : vector<16x16xf32>, vector<16x64xf32>, vector<16x64xf32> -> vector<16x64xf32>
    %64 = arith.addf %62, %63 : vector<16x64xf32>
    %65 = arith.mulf %64, %36 : vector<16x64xf32>
    %66 = arith.negf %65 : vector<16x64xf32>
    %67 = math.exp %66 : vector<16x64xf32>
    %cst_32 = arith.constant 1.000000e+00 : f32
    %68 = vector.broadcast %cst_32 : f32 to vector<16x64xf32>
    %69 = arith.addf %68, %67 : vector<16x64xf32>
    %70 = arith.divf %68, %69 : vector<16x64xf32>
    %cst_33 = arith.constant 2.000000e+00 : f32
    %71 = vector.broadcast %cst_33 : f32 to vector<16x64xf32>
    %72 = arith.mulf %71, %70 : vector<16x64xf32>
    %cst_34 = arith.constant 1.000000e+00 : f32
    %73 = vector.broadcast %cst_34 : f32 to vector<16x64xf32>
    %74 = arith.subf %72, %73 : vector<16x64xf32>
    %75 = arith.select %33, %74, %70 : vector<16x64xi1>, vector<16x64xf32>
    %76 = vector.extract_strided_slice %75 {offsets = [0, 0], sizes = [16, 16], strides = [1, 1]} : vector<16x64xf32> to vector<16x16xf32>
    %77 = vector.extract_strided_slice %75 {offsets = [0, 16], sizes = [16, 16], strides = [1, 1]} : vector<16x64xf32> to vector<16x16xf32>
    %78 = vector.extract_strided_slice %75 {offsets = [0, 32], sizes = [16, 16], strides = [1, 1]} : vector<16x64xf32> to vector<16x16xf32>
    %79 = vector.extract_strided_slice %75 {offsets = [0, 48], sizes = [16, 16], strides = [1, 1]} : vector<16x64xf32> to vector<16x16xf32>
    %80 = arith.mulf %77, %59 : vector<16x16xf32>
    %81 = arith.mulf %76, %78 : vector<16x16xf32>
    %82 = arith.addf %80, %81 : vector<16x16xf32>
    %83 = math.tanh %82 : vector<16x16xf32>
    %84 = arith.mulf %79, %83 : vector<16x16xf32>
    %85 = vector.extract_strided_slice %26 {offsets = [32, 0], sizes = [16, 64], strides = [1, 1]} : vector<64x64xf32> to vector<16x64xf32>
    %cst_35 = arith.constant dense<0.000000e+00> : vector<16x64xf32>
    %86 = tpu.matmul %84, %27, %cst_35 {dimension_numbers = #tpu.dot_dimension_numbers<[1], [0], [0], [1], [0, 0, 1, 1], [], []>} : vector<16x16xf32>, vector<16x64xf32>, vector<16x64xf32> -> vector<16x64xf32>
    %87 = arith.addf %85, %86 : vector<16x64xf32>
    %88 = arith.mulf %87, %36 : vector<16x64xf32>
    %89 = arith.negf %88 : vector<16x64xf32>
    %90 = math.exp %89 : vector<16x64xf32>
    %cst_36 = arith.constant 1.000000e+00 : f32
    %91 = vector.broadcast %cst_36 : f32 to vector<16x64xf32>
    %92 = arith.addf %91, %90 : vector<16x64xf32>
    %93 = arith.divf %91, %92 : vector<16x64xf32>
    %cst_37 = arith.constant 2.000000e+00 : f32
    %94 = vector.broadcast %cst_37 : f32 to vector<16x64xf32>
    %95 = arith.mulf %94, %93 : vector<16x64xf32>
    %cst_38 = arith.constant 1.000000e+00 : f32
    %96 = vector.broadcast %cst_38 : f32 to vector<16x64xf32>
    %97 = arith.subf %95, %96 : vector<16x64xf32>
    %98 = arith.select %33, %97, %93 : vector<16x64xi1>, vector<16x64xf32>
    %99 = vector.extract_strided_slice %98 {offsets = [0, 0], sizes = [16, 16], strides = [1, 1]} : vector<16x64xf32> to vector<16x16xf32>
    %100 = vector.extract_strided_slice %98 {offsets = [0, 16], sizes = [16, 16], strides = [1, 1]} : vector<16x64xf32> to vector<16x16xf32>
    %101 = vector.extract_strided_slice %98 {offsets = [0, 32], sizes = [16, 16], strides = [1, 1]} : vector<16x64xf32> to vector<16x16xf32>
    %102 = vector.extract_strided_slice %98 {offsets = [0, 48], sizes = [16, 16], strides = [1, 1]} : vector<16x64xf32> to vector<16x16xf32>
    %103 = arith.mulf %100, %82 : vector<16x16xf32>
    %104 = arith.mulf %99, %101 : vector<16x16xf32>
    %105 = arith.addf %103, %104 : vector<16x16xf32>
    %106 = math.tanh %105 : vector<16x16xf32>
    %107 = arith.mulf %102, %106 : vector<16x16xf32>
    %108 = vector.extract_strided_slice %26 {offsets = [48, 0], sizes = [16, 64], strides = [1, 1]} : vector<64x64xf32> to vector<16x64xf32>
    %cst_39 = arith.constant dense<0.000000e+00> : vector<16x64xf32>
    %109 = tpu.matmul %107, %27, %cst_39 {dimension_numbers = #tpu.dot_dimension_numbers<[1], [0], [0], [1], [0, 0, 1, 1], [], []>} : vector<16x16xf32>, vector<16x64xf32>, vector<16x64xf32> -> vector<16x64xf32>
    %110 = arith.addf %108, %109 : vector<16x64xf32>
    %111 = arith.mulf %110, %36 : vector<16x64xf32>
    %112 = arith.negf %111 : vector<16x64xf32>
    %113 = math.exp %112 : vector<16x64xf32>
    %cst_40 = arith.constant 1.000000e+00 : f32
    %114 = vector.broadcast %cst_40 : f32 to vector<16x64xf32>
    %115 = arith.addf %114, %113 : vector<16x64xf32>
    %116 = arith.divf %114, %115 : vector<16x64xf32>
    %cst_41 = arith.constant 2.000000e+00 : f32
    %117 = vector.broadcast %cst_41 : f32 to vector<16x64xf32>
    %118 = arith.mulf %117, %116 : vector<16x64xf32>
    %cst_42 = arith.constant 1.000000e+00 : f32
    %119 = vector.broadcast %cst_42 : f32 to vector<16x64xf32>
    %120 = arith.subf %118, %119 : vector<16x64xf32>
    %121 = arith.select %33, %120, %116 : vector<16x64xi1>, vector<16x64xf32>
    %122 = vector.extract_strided_slice %121 {offsets = [0, 0], sizes = [16, 16], strides = [1, 1]} : vector<16x64xf32> to vector<16x16xf32>
    %123 = vector.extract_strided_slice %121 {offsets = [0, 16], sizes = [16, 16], strides = [1, 1]} : vector<16x64xf32> to vector<16x16xf32>
    %124 = vector.extract_strided_slice %121 {offsets = [0, 32], sizes = [16, 16], strides = [1, 1]} : vector<16x64xf32> to vector<16x16xf32>
    %125 = vector.extract_strided_slice %121 {offsets = [0, 48], sizes = [16, 16], strides = [1, 1]} : vector<16x64xf32> to vector<16x16xf32>
    %126 = arith.mulf %123, %105 : vector<16x16xf32>
    %127 = arith.mulf %122, %124 : vector<16x16xf32>
    %128 = arith.addf %126, %127 : vector<16x16xf32>
    %129 = math.tanh %128 : vector<16x16xf32>
    %130 = arith.mulf %125, %129 : vector<16x16xf32>
    %131 = vector.extract_strided_slice %130 {offsets = [0, 0], sizes = [8, 16], strides = [1, 1]} : vector<16x16xf32> to vector<8x16xf32>
    %c0_43 = arith.constant 0 : index
    %c0_44 = arith.constant 0 : index
    %132 = vector.load %arg9[%c0_43, %c0_44] : memref<16x16xf32, #tpu.memory_space<vmem>>, vector<16x16xf32>
    %cst_45 = arith.constant dense<0.000000e+00> : vector<8x16xf32>
    %133 = tpu.matmul %131, %132, %cst_45 {dimension_numbers = #tpu.dot_dimension_numbers<[1], [0], [0], [1], [0, 0, 1, 1], [], []>} : vector<8x16xf32>, vector<16x16xf32>, vector<8x16xf32> -> vector<8x16xf32>
    %134 = vector.extract_strided_slice %130 {offsets = [8, 0], sizes = [8, 16], strides = [1, 1]} : vector<16x16xf32> to vector<8x16xf32>
    %c0_46 = arith.constant 0 : index
    %c0_47 = arith.constant 0 : index
    %135 = vector.load %arg10[%c0_46, %c0_47] : memref<16x16xf32, #tpu.memory_space<vmem>>, vector<16x16xf32>
    %cst_48 = arith.constant dense<0.000000e+00> : vector<8x16xf32>
    %136 = tpu.matmul %134, %135, %cst_48 {dimension_numbers = #tpu.dot_dimension_numbers<[1], [0], [0], [1], [0, 0, 1, 1], [], []>} : vector<8x16xf32>, vector<16x16xf32>, vector<8x16xf32> -> vector<8x16xf32>
    %137 = arith.addf %133, %136 : vector<8x16xf32>
    %c0_49 = arith.constant 0 : index
    %c0_50 = arith.constant 0 : index
    %138 = vector.load %arg11[%c0_49, %c0_50] : memref<1x16xf32, #tpu.memory_space<vmem>>, vector<1x16xf32>
    %139 = vector.broadcast %138 : vector<1x16xf32> to vector<8x16xf32>
    %140 = arith.addf %137, %139 : vector<8x16xf32>
    %c0_51 = arith.constant 0 : index
    %c0_52 = arith.constant 0 : index
    %141 = vector.load %arg12[%c0_51, %c0_52] : memref<8x16xf32, #tpu.memory_space<vmem>>, vector<8x16xf32>
    %142 = arith.mulf %141, %140 : vector<8x16xf32>
    %c0_53 = arith.constant 0 : index
    %c0_54 = arith.constant 0 : index
    %143 = vector.load %arg13[%c0_53, %c0_54] : memref<16x16xf32, #tpu.memory_space<vmem>>, vector<16x16xf32>
    %cst_55 = arith.constant dense<0.000000e+00> : vector<8x16xf32>
    %144 = tpu.matmul %142, %143, %cst_55 {dimension_numbers = #tpu.dot_dimension_numbers<[1], [0], [0], [1], [0, 0, 1, 1], [], []>} : vector<8x16xf32>, vector<16x16xf32>, vector<8x16xf32> -> vector<8x16xf32>
    %c0_56 = arith.constant 0 : index
    %c0_57 = arith.constant 0 : index
    %145 = vector.load %arg14[%c0_56, %c0_57] : memref<1x16xf32, #tpu.memory_space<vmem>>, vector<1x16xf32>
    %146 = vector.broadcast %145 : vector<1x16xf32> to vector<8x16xf32>
    %147 = arith.addf %144, %146 : vector<8x16xf32>
    %c0_58 = arith.constant 0 : index
    %c0_59 = arith.constant 0 : index
    %148 = vector.load %arg15[%c0_58, %c0_59] : memref<8x16xf32, #tpu.memory_space<vmem>>, vector<8x16xf32>
    tpu.vector_store %arg15[%c0_58, %c0_59], %147 {strides = array<i32>} : memref<8x16xf32, #tpu.memory_space<vmem>>, vector<8x16xf32>,
    return
  }
}

</mosaic_0001>

<bundles_post_ra>
// kernel: hdgcn_forward.1
= control target key start
LH: loop header
LB: loop body
LE: loop exit
PB: predicated region body
PF: predicated region fallthrough
CT: control target
= control target key end

     0   :  { %vm69_vm0 = vcmask 130048   ;;  %s3329_s0 = inlined_call_operand.vmem [shape: f32[8,8,8], index: 0, kind: input, shape index: {}]   ;;  %s3330_s1 = inlined_call_operand.vmem [shape: f32[64,16], index: 1, kind: input, shape index: {}]   ;;  %s3331_s2 = inlined_call_operand.vmem [shape: f32[16,32], index: 2, kind: input, shape index: {}]   ;;  %s3332_s3 = inlined_call_operand.vmem [shape: f32[1,32], index: 3, kind: input, shape index: {}]   ;;  %s3333_s4 = inlined_call_operand.vmem [shape: f32[32,16], index: 4, kind: input, shape index: {}]   ;;  %s3334_s5 = inlined_call_operand.vmem [shape: f32[1,16], index: 5, kind: input, shape index: {}]   ;;  %s3335_s6 = inlined_call_operand.vmem [shape: f32[16,64], index: 6, kind: input, shape index: {}]   ;;  %s3336_s7 = inlined_call_operand.vmem [shape: f32[16,64], index: 7, kind: input, shape index: {}]   ;;  %s3337_s8 = inlined_call_operand.vmem [shape: f32[1,64], index: 8, kind: input, shape index: {}]   ;;  %s3338_s9 = inlined_call_operand.vmem [shape: f32[16,16], index: 9, kind: input, shape index: {}]   ;;  %s3339_s10 = inlined_call_operand.vmem [shape: f32[16,16], index: 10, kind: input, shape index: {}]   ;;  %s3340_s11 = inlined_call_operand.vmem [shape: f32[1,16], index: 11, kind: input, shape index: {}]   ;;  %s3341_s12 = inlined_call_operand.vmem [shape: f32[8,16], index: 12, kind: input, shape index: {}]   ;;  %s3342_s13 = inlined_call_operand.vmem [shape: f32[16,16], index: 13, kind: input, shape index: {}]   ;;  %s3343_s14 = inlined_call_operand.vmem [shape: f32[1,16], index: 14, kind: input, shape index: {}]   ;;  %s3344_s15 = inlined_call_operand.hbm [shape: f32[8,16], index: 15, kind: output, shape index: {}]  }
   0x1   :  { %v68_v0 = vld [vmem:[%s3331_s2 + $0x8] sm:$0xff]  ;;  %v67_v1 = vld [vmem:[%s3331_s2] sm:$0xff]  ;;  %v61_v4 = vld [vmem:[%s3330_s1 + $0x10] sm:$0xff] }
   0x2   :  { %v59_v2 = vld [vmem:[%s3330_s1] sm:$0xff]  ;;  %2623 = vmatprep.subr.mxu0 %v68_v0  ;;  %v60_v3 = vld [vmem:[%s3330_s1 + $0x8] sm:$0xff] }
   0x3   :  { %2627 = vmatprep.mubr.msk.f32.mxu0 %vm69_vm0, %v59_v2  ;;  %2624 = vmatpush3.msra.mxu0 %v68_v0 }
   0x4   :  { %2625 = vmatprep.subr.mxu0 %v67_v1 }
   0x5   :  { %20 = vsyncpa [#allocation3], 0  ;;  %2626 = vmatpush3.msra.mxu0 %v67_v1  ;;  %v62_v5 = vld [vmem:[%s3330_s1 + $0x18] sm:$0xff]  ;;  %v63_v6 = vld [vmem:[%s3330_s1 + $0x20] sm:$0xff]  ;;  %v2882_v10 = vmov 0.0   ;;  %vm2883_vm1 = vmmov 0  }
   0x6   :  { %2628 = vmatmul.mubr.msk.f32.vlgmr.msra.gmra.mxu0 %vm69_vm0, %v60_v3  ;;  %v64_v7 = vld [vmem:[%s3330_s1 + $0x28] sm:$0xff]  ;;  %v65_v8 = vld [vmem:[%s3330_s1 + $0x30] sm:$0xff]  ;;  %v66_v9 = vld [vmem:[%s3330_s1 + $0x38] sm:$0xff]  ;;  %2639 = vmatprep.subr.mxu1 %v2882_v10  ;;  %vm206_vm2 = vcmask 64512   ;;  %vm803_vm3 = vcmask 261120   ;;  %s2886_s20 = smov 16  }
   0x7   :  { %2630 = vmatprep.mubr.msk.f32.mxu0 %vm69_vm0, %v61_v4  ;;  %2664 = vmatprep.subr.mxu0 %v2882_v10  ;;  %v3017_v12 = vld [vmem:[%s3329_s0] sm:$0xff]  ;;  %v3027_v15 = vld [vmem:[%s3329_s0 + $0x8] sm:$0xff]  ;;  %v3042_v19 = vld [vmem:[%s3329_s0 + $0x10] sm:$0xff]  ;;  %s2887_s21 = smov 32   ;;  %s2888_s22 = smov 80  }
   0x8   :  { %2641 = vmatprep.mubr.msk.f32.mxu1 %vm2883_vm1, %v2882_v10  ;;  %v3035_v18 = vld [vmem:[%s3329_s0 + $0x28] sm:$0xff]  ;;  %v3057_v21 = vld [vmem:[%s3329_s0 + $0x18] sm:$0xff]  ;;  %v3068_v23 = vld [vmem:[%s3329_s0 + $0x20] sm:$0xff]  ;;  %s2889_s18 = smov [#allocation2]  }
   0x9   :  { %v3078_v25 = vld [vmem:[%s3329_s0 + $0x30] sm:$0xff]  ;;  %v802_v26 = vld [vmem:[%s3333_s4 + $0x18] sm:$0xff]  ;;  %v800_v29 = vld [vmem:[%s3333_s4 + $0x8] sm:$0xff] }
   0xa   :  { %2631 = vmatmul.mubr.msk.f32.gmra.mxu0 %vm69_vm0, %v62_v5  ;;  %v801_v27 = vld [vmem:[%s3333_s4 + $0x10] sm:$0xff]  ;;  %v3091_v28 = vld [vmem:[%s3329_s0 + $0x38] sm:$0xff]  ;;  %v799_v30 = vld [vmem:[%s3333_s4] sm:$0xff] }
   0xb   :  { %2633 = vmatprep.mubr.msk.f32.mxu0 %vm69_vm0, %v63_v6  ;;  %v2472_v31 = vld [vmem:[%s3332_s3] ss:$0 sm:$0xff] }
   0xe   :  { %2634 = vmatmul.mubr.msk.f32.gmra.mxu0 %vm69_vm0, %v64_v7 }
   0xf   :  { %2636 = vmatprep.mubr.msk.f32.mxu0 %vm69_vm0, %v65_v8  ;;  %v1501_v8 = vld [vmem:[%s3335_s6 + $0x8] sm:$0xff] }
  0x12   :  { %2637 = vmatmul.mubr.msk.f32.gmra.mxu0 %vm69_vm0, %v66_v9  ;;  %v3158_v9 = vld [vmem:[%s3336_s7 + $0x8] sm:$0xff] }
  0x13   :  { %2666 = vmatprep.mubr.msk.f32.mxu0 %vm2883_vm1, %v2882_v10 }
  0xc6   :  { %v2629_v11 = vpop.f32.mrf.mxu0 }
  0xc8   :  { %v160_v13 = vpop.f32.mrf.mxu0 }
  0xc9   :  { %2640 = vmatpush3.msra.mxu1 %v160_v13  ;;  %v2489_v13 = vld [vmem:[%s3334_s5] ss:$0 sm:$0xff] }
  0xca   :  { %2642 = vmatmul.mubr.msk.f32.vlgmr.msra.gmra.mxu1 %vm206_vm2, %v3017_v12  ;;  %2644 = vmatprep.subr.mxu1 %v2882_v10  ;;  %v2632_v14 = vpop.f32.mrf.mxu0 }
  0xcb   :  { %2645 = vmatpush3.msra.mxu1 %v2629_v11  ;;  %2646 = vmatprep.mubr.msk.f32.mxu1 %vm2883_vm1, %v2882_v10  ;;  %v1500_v11 = vld [vmem:[%s3335_s6] sm:$0xff]  ;;  %s2456_s6 = sshll.u32 %s2889_s18, 4  ;;  %s2457_s6 = int_to_ptr.vmem [resolvable:$true] %s2456_s6 }
  0xcc   :  { %v170_v16 = vpop.f32.mrf.mxu0  ;;  %2649 = vmatprep.subr.mxu1 %v2882_v10  ;;  %p2865_p1 = scmp.lt.s32.totalorder %s2457_s6, %s2457_s6 }
  0xce   :  { %2647 = vmatmul.mubr.msk.f32.vlgmr.msra.gmra.mxu1 %vm206_vm2, %v3027_v15  ;;  %v2635_v17 = vpop.f32.mrf.mxu0 }
  0xcf   :  { %2650 = vmatpush3.msra.mxu1 %v170_v16  ;;  %2651 = vmatprep.mubr.msk.f32.mxu1 %vm2883_vm1, %v2882_v10 }
  0xd0   :  { %2654 = vmatprep.subr.mxu1 %v2882_v10  ;;  %v180_v20 = vpop.f32.mrf.mxu0  ;;  %2665 = vmatpush3.msra.mxu0 %v2635_v17 }
  0xd1   :  { %2667 = vmatmul.mubr.msk.f32.vlgmr.msra.gmra.mxu0 %vm206_vm2, %v3035_v18  ;;  %2674 = vmatprep.subr.mxu0 %v2882_v10 }
  0xd2   :  { %2652 = vmatmul.mubr.msk.f32.vlgmr.msra.gmra.mxu1 %vm206_vm2, %v3042_v19  ;;  %2676 = vmatprep.mubr.msk.f32.mxu0 %vm2883_vm1, %v2882_v10  ;;  %v2638_v22 = vpop.f32.mrf.mxu0 }
  0xd3   :  { %2655 = vmatpush3.msra.mxu1 %v2632_v14  ;;  %2656 = vmatprep.mubr.msk.f32.mxu1 %vm2883_vm1, %v2882_v10 }
  0xd4   :  { %2659 = vmatprep.subr.mxu1 %v2882_v10  ;;  %2675 = vmatpush3.msra.mxu0 %v2638_v22  ;;  %v190_v24 = vpop.f32.mrf.mxu0 }
  0xd5   :  { %2699 = vmatprep.subr.mxu0 %v2882_v10  ;;  %2677 = vmatmul.mubr.msk.f32.vlgmr.msra.gmra.mxu0 %vm206_vm2, %v3091_v28 }
  0xd6   :  { %2657 = vmatmul.mubr.msk.f32.vlgmr.msra.gmra.mxu1 %vm206_vm2, %v3057_v21  ;;  %2701 = vmatprep.mubr.msk.f32.mxu0 %vm2883_vm1, %v2882_v10 }
  0xd7   :  { %2660 = vmatpush3.msra.mxu1 %v180_v20  ;;  %2661 = vmatprep.mubr.msk.f32.mxu1 %vm2883_vm1, %v2882_v10 }
  0xd8   :  { %2669 = vmatprep.subr.mxu1 %v2882_v10 }
  0xda   :  { %2662 = vmatmul.mubr.msk.f32.vlgmr.msra.gmra.mxu1 %vm206_vm2, %v3068_v23 }
  0xdb   :  { %2670 = vmatpush3.msra.mxu1 %v190_v24  ;;  %2671 = vmatprep.mubr.msk.f32.mxu1 %vm2883_vm1, %v2882_v10 }
  0xdc   :  { %2679 = vmatprep.subr.mxu1 %v802_v26 }
  0xde   :  { %2672 = vmatmul.mubr.msk.f32.vlgmr.msra.gmra.mxu1 %vm206_vm2, %v3078_v25 }
  0xdf   :  { %2680 = vmatpush3.msra.mxu1 %v802_v26 }
  0xe0   :  { %2681 = vmatprep.subr.mxu1 %v801_v27 }
  0xe1   :  { %2682 = vmatpush3.msra.mxu1 %v801_v27 }
  0xe2   :  { %2683 = vmatprep.subr.mxu1 %v800_v29 }
  0xe3   :  { %2684 = vmatpush3.msra.mxu1 %v800_v29 }
  0xe4   :  { %2685 = vmatprep.subr.mxu1 %v799_v30 }
  0xe5   :  { %2686 = vmatpush3.msra.mxu1 %v799_v30 }
  0xe6   :  { %2724 = vmatprep.subr.mxu1 %v2882_v10 }
 0x18a   :  { %v276_v32 = vpop.f32.mrf.mxu1 }
 0x18b   :  { %v277_v33 = vadd.f32 %v2472_v31, %v276_v32 }
 0x18c   :  { %v2643_v34 = vpop.f32.mrf.mxu1 }
 0x18d   :  { %v791_v35 = vmax.f32 %v277_v33, 0.0 }
 0x18e   :  { %v349_v36 = vpop.f32.mrf.mxu1 }
 0x18f   :  { %v350_v37 = vadd.f32 %v2472_v31, %v349_v36  ;;  %2687 = vmatprep.mubr.msk.f32.mxu1 %vm803_vm3, %v791_v35 }
 0x190   :  { %v2648_v38 = vpop.f32.mrf.mxu1 }
 0x191   :  { %v792_v39 = vmax.f32 %v350_v37, 0.0  ;;  %v641_v40 = vpop.f32.mrf.mxu0  ;;  %v1640_v38 = vlaneseq }
 0x192   :  { %v422_v41 = vpop.f32.mrf.mxu1  ;;  %v642_v49 = vadd.f32 %v2472_v31, %v641_v40  ;;  %v3195_v40 = vld [vmem:[%s3337_s8] ss:$0 sm:$0xff]  ;;  %s2885_s8 = smov 96  }
 0x193   :  { %2688 = vmatmul.mubr.msk.f32.vlgmr.msra.gmra.mxu1 %vm803_vm3, %v792_v39  ;;  %v423_v42 = vadd.f32 %v2472_v31, %v422_v41  ;;  %v2668_v43 = vpop.f32.mrf.mxu0  ;;  %v1641_v39 = vand.u32 127, %v1640_v38  ;;  %v2206_v41 = vld [vmem:[%s3339_s10 + $0x8] sm:$0xff] }
 0x194   :  { %v2653_v44 = vpop.f32.mrf.mxu1  ;;  %v796_v53 = vmax.f32 %v642_v49, 0.0 }
 0x195   :  { %v793_v45 = vmax.f32 %v423_v42, 0.0  ;;  %v787_v60 = vpop.f32.mrf.mxu0  ;;  %vm1642_vm4 = vcmp.ge.s32.totalorder %v1641_v39, 32  ;;  %vm1643_vm5 = vcmp.lt.s32.totalorder %v1641_v39, 48 }
 0x196   :  { %v495_v46 = vpop.f32.mrf.mxu1  ;;  %v788_v61 = vadd.f32 %v2472_v31, %v787_v60  ;;  %vm3197_vm6 = vmand %vm1642_vm4, %vm1643_vm5 }
 0x197   :  { %v496_v47 = vadd.f32 %v2472_v31, %v495_v46  ;;  %2690 = vmatprep.mubr.msk.f32.mxu1 %vm803_vm3, %v793_v45  ;;  %v2678_v62 = vpop.f32.mrf.mxu0  ;;  %v2884_v46 = vmov 1.0  }
 0x198   :  { %v2658_v48 = vpop.f32.mrf.mxu1  ;;  %v798_v63 = vmax.f32 %v788_v61, 0.0 }
 0x199   :  { %v794_v50 = vmax.f32 %v496_v47, 0.0  ;;  %v3204_v47 = vsel %vm3197_vm6, 2.0, %v2884_v46 }
 0x19a   :  { %v568_v51 = vpop.f32.mrf.mxu1 }
 0x19b   :  { %2691 = vmatmul.mubr.msk.f32.gmra.mxu1 %vm803_vm3, %v794_v50  ;;  %v569_v52 = vadd.f32 %v2472_v31, %v568_v51 }
 0x19c   :  { %v2663_v54 = vpop.f32.mrf.mxu1 }
 0x19d   :  { %v795_v55 = vmax.f32 %v569_v52, 0.0 }
 0x19e   :  { %v714_v56 = vpop.f32.mrf.mxu1 }
 0x19f   :  { %2693 = vmatprep.mubr.msk.f32.mxu1 %vm803_vm3, %v795_v55  ;;  %v715_v57 = vadd.f32 %v2472_v31, %v714_v56 }
 0x1a0   :  { %2694 = vmatmul.mubr.msk.f32.gmra.mxu1 %vm803_vm3, %v796_v53  ;;  %v2673_v58 = vpop.f32.mrf.mxu1 }
 0x1a1   :  { %v797_v59 = vmax.f32 %v715_v57, 0.0 }
 0x1a3   :  { %2696 = vmatprep.mubr.msk.f32.mxu1 %vm803_vm3, %v797_v59 }
 0x1a4   :  { %2697 = vmatmul.mubr.msk.f32.gmra.mxu1 %vm803_vm3, %v798_v63 }
 0x1a5   :  { %2726 = vmatprep.mubr.msk.f32.mxu1 %vm2883_vm1, %v2882_v10 }
 0x253   :  { %v2689_v0 = vpop.f32.mrf.mxu1 }
 0x255   :  { %v894_v1 = vpop.f32.mrf.mxu1 }
 0x256   :  { %2700 = vmatpush3.msra.mxu0 %v894_v1 }
 0x257   :  { %2702 = vmatmul.mubr.msk.f32.vlgmr.msra.gmra.mxu0 %vm206_vm2, %v3017_v12  ;;  %2704 = vmatprep.subr.mxu0 %v2882_v10  ;;  %v3168_v12 = vld [vmem:[%s3336_s7] sm:$0xff] }
 0x258   :  { %2705 = vmatpush3.msra.mxu0 %v2689_v0  ;;  %2706 = vmatprep.mubr.msk.f32.mxu0 %vm2883_vm1, %v2882_v10 }
 0x259   :  { %2709 = vmatprep.subr.mxu0 %v2882_v10 }
 0x25b   :  { %2707 = vmatmul.mubr.msk.f32.vlgmr.msra.gmra.mxu0 %vm206_vm2, %v3027_v15  ;;  %v2692_v2 = vpop.f32.mrf.mxu1 }
 0x25c   :  { %2711 = vmatprep.mubr.msk.f32.mxu0 %vm2883_vm1, %v2882_v10 }
 0x25d   :  { %v904_v3 = vpop.f32.mrf.mxu1 }
 0x25e   :  { %2710 = vmatpush3.msra.mxu0 %v904_v3 }
 0x25f   :  { %2714 = vmatprep.subr.mxu0 %v2882_v10  ;;  %2712 = vmatmul.mubr.msk.f32.vlgmr.msra.gmra.mxu0 %vm206_vm2, %v3042_v19 }
 0x260   :  { %2715 = vmatpush3.msra.mxu0 %v2692_v2  ;;  %v2695_v4 = vpop.f32.mrf.mxu1  ;;  %2716 = vmatprep.mubr.msk.f32.mxu0 %vm2883_vm1, %v2882_v10 }
 0x261   :  { %2719 = vmatprep.subr.mxu0 %v2882_v10  ;;  %2725 = vmatpush3.msra.mxu1 %v2695_v4 }
 0x262   :  { %v914_v5 = vpop.f32.mrf.mxu1  ;;  %2734 = vmatprep.subr.mxu1 %v2882_v10  ;;  %2727 = vmatmul.mubr.msk.f32.vlgmr.msra.gmra.mxu1 %vm206_vm2, %v3035_v18 }
 0x263   :  { %2717 = vmatmul.mubr.msk.f32.vlgmr.msra.gmra.mxu0 %vm206_vm2, %v3057_v21  ;;  %2736 = vmatprep.mubr.msk.f32.mxu1 %vm2883_vm1, %v2882_v10 }
 0x264   :  { %2720 = vmatpush3.msra.mxu0 %v914_v5  ;;  %2721 = vmatprep.mubr.msk.f32.mxu0 %vm2883_vm1, %v2882_v10  ;;  %v2698_v6 = vpop.f32.mrf.mxu1 }
 0x265   :  { %2729 = vmatprep.subr.mxu0 %v2882_v10  ;;  %2735 = vmatpush3.msra.mxu1 %v2698_v6 }
 0x266   :  { %v924_v7 = vpop.f32.mrf.mxu1  ;;  %2737 = vmatmul.mubr.msk.f32.vlgmr.msra.gmra.mxu1 %vm206_vm2, %v3091_v28  ;;  %2755 = vmatprep.subr.mxu1 %v3158_v9 }
 0x267   :  { %2722 = vmatmul.mubr.msk.f32.vlgmr.msra.gmra.mxu0 %vm206_vm2, %v3068_v23  ;;  %2759 = vmatprep.mubr.f32.mxu1 %v2882_v10 }
 0x268   :  { %2731 = vmatprep.mubr.msk.f32.mxu0 %vm2883_vm1, %v2882_v10  ;;  %2730 = vmatpush3.msra.mxu0 %v924_v7 }
 0x269   :  { %2739 = vmatprep.subr.mxu0 %v1501_v8  ;;  %2756 = vmatpush3.msra.mxu1 %v3158_v9 }
 0x26a   :  { %2757 = vmatprep.subr.mxu1 %v3168_v12 }
 0x26b   :  { %2732 = vmatmul.mubr.msk.f32.vlgmr.msra.gmra.mxu0 %vm206_vm2, %v3078_v25  ;;  %2758 = vmatpush3.msra.mxu1 %v3168_v12 }
 0x26c   :  { %2740 = vmatpush3.msra.mxu0 %v1501_v8  ;;  %2760 = vmatmul.mubr.f32.vlgmr.msra.gmra.mxu1 %v2882_v10 }
 0x26d   :  { %2741 = vmatprep.subr.mxu0 %v1500_v11  ;;  %2762 = vmatprep.subr.mxu1 %v3158_v9 }
 0x26e   :  { %2742 = vmatpush3.msra.mxu0 %v1500_v11  ;;  %2763 = vmatpush3.msra.mxu1 %v3158_v9 }
 0x26f   :  { %2783 = vmatprep.subr.mxu0 %v2882_v10  ;;  %2764 = vmatprep.subr.mxu1 %v3168_v12 }
 0x270   :  { %2765 = vmatpush3.msra.mxu1 %v3168_v12 }
 0x271   :  { %2769 = vmatprep.subr.mxu1 %v3158_v9 }
 0x317   :  { %v1006_v14 = vpop.f32.mrf.mxu0 }
 0x318   :  { %v1007_v15 = vadd.f32 %v2489_v13, %v1006_v14 }
 0x319   :  { %v2703_v16 = vpop.f32.mrf.mxu0 }
 0x31a   :  { %2743 = vmatprep.mubr.msk.f32.mxu0 %vm69_vm0, %v1007_v15 }
 0x31b   :  { %v1076_v17 = vpop.f32.mrf.mxu0 }
 0x31c   :  { %v1077_v18 = vadd.f32 %v2489_v13, %v1076_v17 }
 0x31d   :  { %v2708_v19 = vpop.f32.mrf.mxu0 }
 0x31e   :  { %2744 = vmatmul.mubr.msk.f32.vlgmr.msra.gmra.mxu0 %vm69_vm0, %v1077_v18 }
 0x31f   :  { %v1146_v20 = vpop.f32.mrf.mxu0  ;;  %2784 = vmatpush3.msra.mxu0 %v2206_v41 }
 0x320   :  { %v1147_v21 = vadd.f32 %v2489_v13, %v1146_v20  ;;  %2785 = vmatprep.subr.mxu0 %v2882_v10 }
 0x321   :  { %v2713_v22 = vpop.f32.mrf.mxu0 }
 0x322   :  { %2746 = vmatprep.mubr.msk.f32.mxu0 %vm69_vm0, %v1147_v21  ;;  %v1356_v23 = vpop.f32.mrf.mxu1 }
 0x323   :  { %v1216_v24 = vpop.f32.mrf.mxu0  ;;  %v1357_v29 = vadd.f32 %v2489_v13, %v1356_v23 }
 0x324   :  { %v1217_v25 = vadd.f32 %v2489_v13, %v1216_v24  ;;  %v2728_v26 = vpop.f32.mrf.mxu1 }
 0x325   :  { %v2718_v27 = vpop.f32.mrf.mxu0 }
 0x326   :  { %2747 = vmatmul.mubr.msk.f32.gmra.mxu0 %vm69_vm0, %v1217_v25  ;;  %v1496_v32 = vpop.f32.mrf.mxu1 }
 0x327   :  { %v1286_v28 = vpop.f32.mrf.mxu0  ;;  %v1497_v34 = vadd.f32 %v2489_v13, %v1496_v32 }
 0x328   :  { %v1287_v30 = vadd.f32 %v2489_v13, %v1286_v28  ;;  %v2738_v35 = vpop.f32.mrf.mxu1 }
 0x329   :  { %v2723_v31 = vpop.f32.mrf.mxu0 }
 0x32a   :  { %2749 = vmatprep.mubr.msk.f32.mxu0 %vm69_vm0, %v1287_v30 }
 0x32b   :  { %2750 = vmatmul.mubr.msk.f32.gmra.mxu0 %vm69_vm0, %v1357_v29  ;;  %v1426_v33 = vpop.f32.mrf.mxu0 }
 0x32c   :  { %v1427_v36 = vadd.f32 %v2489_v13, %v1426_v33  ;;  %v2761_v43 = vpop.f32.mrf.mxu1 }
 0x32d   :  { %v2733_v37 = vpop.f32.mrf.mxu0 }
 0x32e   :  { %2752 = vmatprep.mubr.msk.f32.mxu0 %vm69_vm0, %v1427_v36  ;;  %v1715_v50 = vpop.f32.mrf.mxu1 }
 0x32f   :  { %2753 = vmatmul.mubr.msk.f32.gmra.mxu0 %vm69_vm0, %v1497_v34 }
 0x330   :  { %2787 = vmatprep.mubr.msk.f32.mxu0 %vm2883_vm1, %v2882_v10 }
 0x3de   :  { %v2745_v42 = vpop.f32.mrf.mxu0 }
 0x3df   :  { %v1605_v44 = vadd.f32 %v2745_v42, %v3195_v40 }
 0x3e0   :  { %v1599_v45 = vpop.f32.mrf.mxu0 }
 0x3e1   :  { %v1600_v48 = vadd.f32 %v3195_v40, %v1599_v45  ;;  %v1725_v49 = vadd.f32 %v2761_v43, %v1605_v44 }
 0x3e3   :  { %v1727_v51 = vmul.f32 %v1725_v49, %v3204_v47  ;;  %v1724_v52 = vadd.f32 %v1715_v50, %v1600_v48 }
 0x3e5   :  { %v2508_v53 = vmul.f32 -1.442695, %v1727_v51  ;;  %v1726_v54 = vmul.f32 %v1724_v52, %v3204_v47 }
 0x3e6   :  { %v2748_v25 = vpop.f32.mrf.mxu0 }
 0x3e7   :  { %2812 = vpow2.f32 %v2508_v53  ;;  %v2507_v55 = vmul.f32 -1.442695, %v1726_v54  ;;  %v1615_v27 = vadd.f32 %v2748_v25, %v3195_v40 }
 0x3e8   :  { %v1609_v26 = vpop.f32.mrf.mxu0 }
 0x3e9   :  { %2814 = vpow2.f32 %v2507_v55  ;;  %v1610_v29 = vadd.f32 %v3195_v40, %v1609_v26 }
 0x3f4   :  { %v2813_v56 = vpop.eup %2812 }
 0x3f5   :  { %v1735_v57 = vadd.f32 1.0, %v2813_v56 }
 0x3f6   :  { %v2815_v58 = vpop.eup %2814 }
 0x3f7   :  { %2816 = vrcp.f32 %v1735_v57  ;;  %v1734_v59 = vadd.f32 1.0, %v2815_v58 }
 0x3f9   :  { %2818 = vrcp.f32 %v1734_v59 }
 0x404   :  { %v2817_v60 = vpop.eup %2816 }
 0x405   :  { %v1741_v63 = vmul.f32 2.0, %v2817_v60 }
 0x406   :  { %v2819_v61 = vpop.eup %2818 }
 0x407   :  { %v1740_v62 = vmul.f32 2.0, %v2819_v61  ;;  %v2510_v2 = vadd.f32 -1.0, %v1741_v63 }
 0x409   :  { %v2509_v0 = vadd.f32 -1.0, %v1740_v62  ;;  %v1745_v3 = vsel %vm3197_vm6, %v2510_v2, %v2817_v60 }
 0x40a   :  { %v1747_v14 = vmul.f32 0.0, %v1745_v3 }
 0x40b   :  { %v1744_v1 = vsel %vm3197_vm6, %v2509_v0, %v2819_v61 }
 0x40c   :  { %1750 = vrot.lane.b32.xlu0 %v1744_v1, %s2885_s8  ;;  %v1746_v8 = vmul.f32 0.0, %v1744_v1 }
 0x410   :  { %1752 = vrot.lane.b32.xlu0 %v1745_v3, %s2885_s8 }
 0x47e   :  { %v1751_v4 = vpop.permute.xlu0 %1750 }
 0x47f   :  { %v1756_v5 = vmul.f32 %v1751_v4, %v1744_v1 }
 0x481   :  { %1760 = vrot.lane.b32.xlu1 %v1756_v5, %s2886_s20 }
 0x482   :  { %v1753_v6 = vpop.permute.xlu0 %1752 }
 0x483   :  { %v1757_v7 = vmul.f32 %v1753_v6, %v1745_v3  ;;  %v2751_v6 = vpop.f32.mrf.mxu0 }
 0x485   :  { %1762 = vrot.lane.b32.xlu1 %v1757_v7, %s2886_s20  ;;  %v1619_v7 = vpop.f32.mrf.mxu0 }
 0x4f3   :  { %v1761_v11 = vpop.permute.xlu1 %1760 }
 0x4f4   :  { %v3217_v13 = vadd.f32 %v1761_v11, %v1746_v8  ;;  %v1625_v8 = vadd.f32 %v2751_v6, %v3195_v40 }
 0x4f6   :  { %2820 = vtanh.f32 %v3217_v13 }
 0x4f7   :  { %v1763_v15 = vpop.permute.xlu1 %1762 }
 0x4f8   :  { %v1767_v16 = vadd.f32 %v1763_v15, %v1747_v14 }
 0x4fa   :  { %2822 = vtanh.f32 %v1767_v16 }
 0x503   :  { %v2821_v17 = vpop.eup %2820 }
 0x504   :  { %1772 = vrot.lane.b32.xlu0 %v2821_v17, %s2887_s21 }
 0x507   :  { %v2823_v18 = vpop.eup %2822 }
 0x508   :  { %1774 = vrot.lane.b32.xlu1 %v2823_v18, %s2887_s21 }
 0x576   :  { %v1773_v19 = vpop.permute.xlu0 %1772 }
 0x577   :  { %v1778_v20 = vmul.f32 %v1773_v19, %v1744_v1 }
 0x579   :  { %1782 = vrot.lane.b32.xlu0 %v1778_v20, %s2888_s22 }
 0x57a   :  { %v1775_v21 = vpop.permute.xlu1 %1774 }
 0x57b   :  { %v1779_v22 = vmul.f32 %v1775_v21, %v1745_v3 }
 0x57d   :  { %1784 = vrot.lane.b32.xlu1 %v1779_v22, %s2888_s22 }
 0x5eb   :  { %v1783_v23 = vpop.permute.xlu0 %1782 }
 0x5ec   :  { %2766 = vmatprep.mubr.msk.f32.mxu1 %vm69_vm0, %v1783_v23 }
 0x5ef   :  { %v1785_v24 = vpop.permute.xlu1 %1784 }
 0x5f0   :  { %2767 = vmatmul.mubr.msk.f32.vlgmr.msra.gmra.mxu1 %vm69_vm0, %v1785_v24 }
 0x5f1   :  { %2770 = vmatpush3.msra.mxu1 %v3158_v9 }
 0x5f2   :  { %2771 = vmatprep.subr.mxu1 %v3168_v12 }
 0x5f3   :  { %2772 = vmatpush3.msra.mxu1 %v3168_v12 }
 0x5f4   :  { %2776 = vmatprep.subr.mxu1 %v3158_v9 }
 0x6b0   :  { %v2768_v28 = vpop.f32.mrf.mxu1 }
 0x6b1   :  { %v1866_v30 = vadd.f32 %v2768_v28, %v1615_v27 }
 0x6b2   :  { %v1856_v31 = vpop.f32.mrf.mxu1 }
 0x6b3   :  { %v1868_v32 = vmul.f32 %v1866_v30, %v3204_v47  ;;  %v1865_v33 = vadd.f32 %v1856_v31, %v1610_v29 }
 0x6b5   :  { %v2514_v34 = vmul.f32 -1.442695, %v1868_v32  ;;  %v1867_v35 = vmul.f32 %v1865_v33, %v3204_v47 }
 0x6b7   :  { %2824 = vpow2.f32 %v2514_v34  ;;  %v2513_v36 = vmul.f32 -1.442695, %v1867_v35 }
 0x6b9   :  { %2826 = vpow2.f32 %v2513_v36 }
 0x6c4   :  { %v2825_v37 = vpop.eup %2824 }
 0x6c5   :  { %v1876_v38 = vadd.f32 1.0, %v2825_v37 }
 0x6c6   :  { %v2827_v39 = vpop.eup %2826 }
 0x6c7   :  { %2828 = vrcp.f32 %v1876_v38  ;;  %v1875_v42 = vadd.f32 1.0, %v2827_v39 }
 0x6c9   :  { %2830 = vrcp.f32 %v1875_v42 }
 0x6d4   :  { %v2829_v43 = vpop.eup %2828 }
 0x6d5   :  { %v1882_v44 = vmul.f32 2.0, %v2829_v43 }
 0x6d6   :  { %v2831_v45 = vpop.eup %2830 }
 0x6d7   :  { %v2516_v46 = vadd.f32 -1.0, %v1882_v44  ;;  %v1881_v48 = vmul.f32 2.0, %v2831_v45 }
 0x6d9   :  { %v1886_v49 = vsel %vm3197_vm6, %v2516_v46, %v2829_v43  ;;  %v2515_v50 = vadd.f32 -1.0, %v1881_v48 }
 0x6da   :  { %1893 = vrot.lane.b32.xlu1 %v1886_v49, %s2885_s8  ;;  %v1888_v56 = vmul.f32 %v1886_v49, %v1767_v16 }
 0x6db   :  { %v1885_v51 = vsel %vm3197_vm6, %v2515_v50, %v2831_v45 }
 0x6dc   :  { %1891 = vrot.lane.b32.xlu0 %v1885_v51, %s2885_s8  ;;  %v1887_v59 = vmul.f32 %v1885_v51, %v3217_v13  ;;  %v1620_v13 = vadd.f32 %v3195_v40, %v1619_v7 }
 0x74c   :  { %v1894_v52 = vpop.permute.xlu1 %1893 }
 0x74d   :  { %v1898_v53 = vmul.f32 %v1894_v52, %v1886_v49  ;;  %v2754_v52 = vpop.f32.mrf.mxu0 }
 0x74e   :  { %v1892_v54 = vpop.permute.xlu0 %1891 }
 0x74f   :  { %v1897_v55 = vmul.f32 %v1892_v54, %v1885_v51  ;;  %1903 = vrot.lane.b32.xlu1 %v1898_v53, %s2886_s20  ;;  %v1629_v53 = vpop.f32.mrf.mxu0  ;;  %v1635_v54 = vadd.f32 %v2754_v52, %v3195_v40 }
 0x751   :  { %1901 = vrot.lane.b32.xlu0 %v1897_v55, %s2886_s20 }
 0x7c1   :  { %v1904_v57 = vpop.permute.xlu1 %1903 }
 0x7c2   :  { %v1908_v58 = vadd.f32 %v1904_v57, %v1888_v56  ;;  %v1630_v56 = vadd.f32 %v3195_v40, %v1629_v53 }
 0x7c3   :  { %v1902_v60 = vpop.permute.xlu0 %1901 }
 0x7c4   :  { %2832 = vtanh.f32 %v1908_v58  ;;  %v1907_v61 = vadd.f32 %v1902_v60, %v1887_v59 }
 0x7c6   :  { %2834 = vtanh.f32 %v1907_v61 }
 0x7d1   :  { %v2833_v62 = vpop.eup %2832 }
 0x7d2   :  { %1915 = vrot.lane.b32.xlu1 %v2833_v62, %s2887_s21 }
 0x7d3   :  { %v2835_v63 = vpop.eup %2834 }
 0x7d4   :  { %1913 = vrot.lane.b32.xlu0 %v2835_v63, %s2887_s21 }
 0x844   :  { %v1916_v0 = vpop.permute.xlu1 %1915 }
 0x845   :  { %v1920_v1 = vmul.f32 %v1916_v0, %v1886_v49 }
 0x846   :  { %v1914_v2 = vpop.permute.xlu0 %1913 }
 0x847   :  { %v1919_v3 = vmul.f32 %v1914_v2, %v1885_v51  ;;  %1925 = vrot.lane.b32.xlu1 %v1920_v1, %s2888_s22 }
 0x849   :  { %1923 = vrot.lane.b32.xlu0 %v1919_v3, %s2888_s22 }
 0x8b9   :  { %v1926_v5 = vpop.permute.xlu1 %1925 }
 0x8bb   :  { %v1924_v4 = vpop.permute.xlu0 %1923 }
 0x8bc   :  { %2773 = vmatprep.mubr.msk.f32.mxu1 %vm69_vm0, %v1924_v4 }
 0x8bd   :  { %2774 = vmatmul.mubr.msk.f32.vlgmr.msra.gmra.mxu1 %vm69_vm0, %v1926_v5 }
 0x8be   :  { %2777 = vmatpush3.msra.mxu1 %v3158_v9 }
 0x8bf   :  { %2778 = vmatprep.subr.mxu1 %v3168_v12 }
 0x8c0   :  { %2779 = vmatpush3.msra.mxu1 %v3168_v12 }
 0x8c1   :  { %2790 = vmatprep.subr.mxu1 %v2882_v10 }
 0x97d   :  { %v2775_v11 = vpop.f32.mrf.mxu1 }
 0x97e   :  { %v2007_v14 = vadd.f32 %v2775_v11, %v1625_v8 }
 0x97f   :  { %v1997_v15 = vpop.f32.mrf.mxu1 }
 0x980   :  { %v2009_v16 = vmul.f32 %v2007_v14, %v3204_v47  ;;  %v2006_v17 = vadd.f32 %v1997_v15, %v1620_v13 }
 0x982   :  { %v2520_v18 = vmul.f32 -1.442695, %v2009_v16  ;;  %v2008_v9 = vmul.f32 %v2006_v17, %v3204_v47 }
 0x984   :  { %2836 = vpow2.f32 %v2520_v18  ;;  %v2519_v19 = vmul.f32 -1.442695, %v2008_v9 }
 0x986   :  { %2838 = vpow2.f32 %v2519_v19 }
 0x991   :  { %v2837_v12 = vpop.eup %2836 }
 0x992   :  { %v2017_v20 = vadd.f32 1.0, %v2837_v12 }
 0x993   :  { %v2839_v21 = vpop.eup %2838 }
 0x994   :  { %2840 = vrcp.f32 %v2017_v20  ;;  %v2016_v22 = vadd.f32 1.0, %v2839_v21  ;;  %v2205_v21 = vld [vmem:[%s3339_s10] sm:$0xff] }
 0x995   :  { %2786 = vmatpush3.msra.mxu0 %v2205_v21 }
 0x996   :  { %2842 = vrcp.f32 %v2016_v22  ;;  %v2204_v22 = vld [vmem:[%s3338_s9 + $0x8] sm:$0xff]  ;;  %2797 = vmatprep.subr.mxu0 %v2882_v10 }
 0x9a1   :  { %v2841_v23 = vpop.eup %2840 }
 0x9a2   :  { %v2023_v24 = vmul.f32 2.0, %v2841_v23 }
 0x9a3   :  { %v2843_v25 = vpop.eup %2842 }
 0x9a4   :  { %v2522_v26 = vadd.f32 -1.0, %v2023_v24  ;;  %v2022_v27 = vmul.f32 2.0, %v2843_v25 }
 0x9a6   :  { %v2027_v28 = vsel %vm3197_vm6, %v2522_v26, %v2841_v23  ;;  %v2521_v29 = vadd.f32 -1.0, %v2022_v27 }
 0x9a7   :  { %2034 = vrot.lane.b32.xlu1 %v2027_v28, %s2885_s8  ;;  %v2029_v35 = vmul.f32 %v2027_v28, %v1908_v58 }
 0x9a8   :  { %v2026_v30 = vsel %vm3197_vm6, %v2521_v29, %v2843_v25  ;;  %v2203_v25 = vld [vmem:[%s3338_s9] sm:$0xff] }
 0x9a9   :  { %2032 = vrot.lane.b32.xlu0 %v2026_v30, %s2885_s8  ;;  %v2028_v38 = vmul.f32 %v2026_v30, %v1907_v61 }
 0xa19   :  { %v2035_v31 = vpop.permute.xlu1 %2034 }
 0xa1a   :  { %v2039_v32 = vmul.f32 %v2035_v31, %v2027_v28 }
 0xa1b   :  { %v2033_v33 = vpop.permute.xlu0 %2032 }
 0xa1c   :  { %v2038_v34 = vmul.f32 %v2033_v33, %v2026_v30  ;;  %2044 = vrot.lane.b32.xlu1 %v2039_v32, %s2886_s20  ;;  %v2368_v32 = vld [vmem:[%s3342_s13 + $0x8] sm:$0xff]  ;;  %v2367_v33 = vld [vmem:[%s3342_s13] sm:$0xff] }
 0xa1e   :  { %2042 = vrot.lane.b32.xlu0 %v2038_v34, %s2886_s20 }
 0xa8e   :  { %v2045_v36 = vpop.permute.xlu1 %2044 }
 0xa8f   :  { %v2049_v37 = vadd.f32 %v2045_v36, %v2029_v35 }
 0xa90   :  { %v2043_v39 = vpop.permute.xlu0 %2042 }
 0xa91   :  { %2844 = vtanh.f32 %v2049_v37  ;;  %v2048_v42 = vadd.f32 %v2043_v39, %v2028_v38  ;;  %v2365_v39 = vld [vmem:[%s3341_s12] sm:$0xff] }
 0xa93   :  { %2846 = vtanh.f32 %v2048_v42 }
 0xa9e   :  { %v2845_v43 = vpop.eup %2844 }
 0xa9f   :  { %2056 = vrot.lane.b32.xlu1 %v2845_v43, %s2887_s21 }
 0xaa0   :  { %v2847_v44 = vpop.eup %2846 }
 0xaa1   :  { %2054 = vrot.lane.b32.xlu0 %v2847_v44, %s2887_s21  ;;  %v2532_v44 = vld [vmem:[%s3343_s14] ss:$0 sm:$0xff] }
 0xb11   :  { %v2057_v45 = vpop.permute.xlu1 %2056 }
 0xb12   :  { %v2061_v46 = vmul.f32 %v2057_v45, %v2027_v28 }
 0xb13   :  { %v2055_v48 = vpop.permute.xlu0 %2054 }
 0xb14   :  { %v2060_v49 = vmul.f32 %v2055_v48, %v2026_v30  ;;  %2066 = vrot.lane.b32.xlu1 %v2061_v46, %s2888_s22 }
 0xb16   :  { %2064 = vrot.lane.b32.xlu0 %v2060_v49, %s2888_s22 }
 0xb86   :  { %v2067_v51 = vpop.permute.xlu1 %2066 }
 0xb88   :  { %v2065_v50 = vpop.permute.xlu0 %2064 }
 0xb89   :  { %2780 = vmatprep.mubr.msk.f32.mxu1 %vm69_vm0, %v2065_v50 }
 0xb8a   :  { %2781 = vmatmul.mubr.msk.f32.vlgmr.msra.gmra.mxu1 %vm69_vm0, %v2067_v51 }
 0xb8b   :  { %2794 = vmatprep.mubr.msk.f32.mxu1 %vm2883_vm1, %v2882_v10  ;;  %2791 = vmatpush3.msra.mxu1 %v2204_v22 }
 0xb8c   :  { %2792 = vmatprep.subr.mxu1 %v2882_v10 }
 0xb8d   :  { %2793 = vmatpush3.msra.mxu1 %v2203_v25 }
 0xc4a   :  { %v2782_v55 = vpop.f32.mrf.mxu1 }
 0xc4b   :  { %v2148_v57 = vadd.f32 %v2782_v55, %v1635_v54 }
 0xc4c   :  { %v2138_v58 = vpop.f32.mrf.mxu1 }
 0xc4d   :  { %v2150_v59 = vmul.f32 %v2148_v57, %v3204_v47  ;;  %v2147_v60 = vadd.f32 %v2138_v58, %v1630_v56 }
 0xc4f   :  { %v2526_v61 = vmul.f32 -1.442695, %v2150_v59  ;;  %v2149_v62 = vmul.f32 %v2147_v60, %v3204_v47 }
 0xc51   :  { %2848 = vpow2.f32 %v2526_v61  ;;  %v2525_v63 = vmul.f32 -1.442695, %v2149_v62 }
 0xc53   :  { %2850 = vpow2.f32 %v2525_v63 }
 0xc5e   :  { %v2849_v0 = vpop.eup %2848 }
 0xc5f   :  { %v2158_v1 = vadd.f32 1.0, %v2849_v0 }
 0xc60   :  { %v2851_v2 = vpop.eup %2850 }
 0xc61   :  { %2852 = vrcp.f32 %v2158_v1  ;;  %v2157_v3 = vadd.f32 1.0, %v2851_v2 }
 0xc63   :  { %2854 = vrcp.f32 %v2157_v3 }
 0xc6e   :  { %v2853_v4 = vpop.eup %2852 }
 0xc6f   :  { %v2164_v5 = vmul.f32 2.0, %v2853_v4 }
 0xc70   :  { %v2855_v40 = vpop.eup %2854 }
 0xc71   :  { %v2528_v6 = vadd.f32 -1.0, %v2164_v5  ;;  %v2163_v7 = vmul.f32 2.0, %v2855_v40 }
 0xc73   :  { %v2168_v8 = vsel %vm3197_vm6, %v2528_v6, %v2853_v4  ;;  %v2527_v11 = vadd.f32 -1.0, %v2163_v7 }
 0xc74   :  { %2175 = vrot.lane.b32.xlu1 %v2168_v8, %s2885_s8  ;;  %v2170_v17 = vmul.f32 %v2168_v8, %v2049_v37  ;;  %v2531_v37 = vld [vmem:[%s3340_s11] ss:$0 sm:$0xff]  ;;  %s2860_s11 = scalar_lea.vmem %s2457_s6, 128 }
 0xc75   :  { %v2167_v47 = vsel %vm3197_vm6, %v2527_v11, %v2855_v40  ;;  %p2861_p0 = scmp.ne.s32.totalorder %s2457_s6, %s2860_s11  ;;  %p2866_p2 = scmp.lt.s32.totalorder %s2860_s11, %s2860_s11 }
 0xc76   :  { %2173 = vrot.lane.b32.xlu0 %v2167_v47, %s2885_s8  ;;  %v2169_v19 = vmul.f32 %v2167_v47, %v2048_v42 }
 0xc77   :  { %p2867_p3 = por %p2866_p2, %p2865_p1 }
 0xc79   :  { %p2868_p4 = pnand %p2867_p3, %p2861_p0 }
 0xce6   :  { %v2176_v13 = vpop.permute.xlu1 %2175 }
 0xce7   :  { %v2180_v14 = vmul.f32 %v2176_v13, %v2168_v8 }
 0xce8   :  { %v2174_v15 = vpop.permute.xlu0 %2173 }
 0xce9   :  { %v2179_v16 = vmul.f32 %v2174_v15, %v2167_v47  ;;  %2185 = vrot.lane.b32.xlu1 %v2180_v14, %s2886_s20 }
 0xceb   :  { %2183 = vrot.lane.b32.xlu0 %v2179_v16, %s2886_s20 }
 0xd5b   :  { %v2186_v18 = vpop.permute.xlu1 %2185 }
 0xd5c   :  { %v2190_v9 = vadd.f32 %v2186_v18, %v2170_v17 }
 0xd5d   :  { %v2184_v12 = vpop.permute.xlu0 %2183 }
 0xd5e   :  { %2856 = vtanh.f32 %v2190_v9  ;;  %v2189_v20 = vadd.f32 %v2184_v12, %v2169_v19 }
 0xd60   :  { %2858 = vtanh.f32 %v2189_v20 }
 0xd6b   :  { %v2857_v23 = vpop.eup %2856 }
 0xd6c   :  { %2197 = vrot.lane.b32.xlu1 %v2857_v23, %s2887_s21 }
 0xd6d   :  { %v2859_v24 = vpop.eup %2858 }
 0xd6e   :  { %2195 = vrot.lane.b32.xlu0 %v2859_v24, %s2887_s21 }
 0xdde   :  { %v2198_v26 = vpop.permute.xlu1 %2197 }
 0xddf   :  { %v2202_v27 = vmul.f32 %v2198_v26, %v2168_v8 }
 0xde0   :  { %v2196_v28 = vpop.permute.xlu0 %2195 }
 0xde1   :  { %v2201_v29 = vmul.f32 %v2196_v28, %v2167_v47  ;;  %2208 = vrot.lane.b32.xlu0 %v2202_v27, %s2888_s22 }
 0xde3   :  { %2283 = vrot.lane.b32.xlu1 %v2201_v29, %s2888_s22 }
 0xe53   :  { %v2209_v30 = vpop.permute.xlu0 %2208 }
 0xe54   :  { %2788 = vmatmul.mubr.msk.f32.vlgmr.msra.gmra.mxu0 %vm69_vm0, %v2209_v30 }
 0xe55   :  { %v2284_v31 = vpop.permute.xlu1 %2283  ;;  %2801 = vmatprep.mubr.msk.f32.mxu0 %vm2883_vm1, %v2882_v10  ;;  %2798 = vmatpush3.msra.mxu0 %v2368_v32 }
 0xe56   :  { %2795 = vmatmul.mubr.msk.f32.vlgmr.msra.gmra.mxu1 %vm69_vm0, %v2284_v31  ;;  %2799 = vmatprep.subr.mxu0 %v2882_v10 }
 0xe57   :  { %2800 = vmatpush3.msra.mxu0 %v2367_v33 }
 0xf14   :  { %v2278_v34 = vpop.f32.mrf.mxu0 }
 0xf16   :  { %v2789_v35 = vpop.f32.mrf.mxu0  ;;  %v2353_v36 = vpop.f32.mrf.mxu1 }
 0xf17   :  { %v2354_v38 = vadd.f32 %v2353_v36, %v2278_v34 }
 0xf18   :  { %v2796_v42 = vpop.f32.mrf.mxu1 }
 0xf19   :  { %v2364_v43 = vadd.f32 %v2531_v37, %v2354_v38 }
 0xf1b   :  { %v2366_v10 = vmul.f32 %v2365_v39, %v2364_v43 }
 0xf1d   :  { %2802 = vmatmul.mubr.msk.f32.vlgmr.msra.gmra.mxu0 %vm69_vm0, %v2366_v10 }
 0xfdd   :  { %v2445_v45 = vpop.f32.mrf.mxu0 }
 0xfde   :  { %v2446_v46 = vadd.f32 %v2532_v44, %v2445_v45 }
 0xfdf   :  { %v2803_v48 = vpop.f32.mrf.mxu0 }
 0xfe0   :  { %2449 = vst.msk [vmem:[#allocation2] sm:$0xff] %vm69_vm0, %v2446_v46 }
 0xfe1   :  { %2871 = shalt.err (!%p2868_p4)
}
 0xfe2   :  { %2459 = dma.vmem_to_hbm [thread:$0]  %s2457_s6, 128, %s3344_s15, [#allocation3]  }
 0xfe3   :  { %2880 = dma.done.wait [#allocation3], 128  }
 0xfe4   :  { %2881 = vsyncadd [#allocation3], 4294967168 }
 0xfe5   :  { %2463 = vsyncpa [#allocation3], 1 }

</bundles_post_ra>
